<compile_context>
chip_gen: v5e
topology: v5e:2x2
jax: 0.10.0
libtpu: 0.0.40
codegen_flags: <defaults>
</compile_context>

<pallas_src>
import jax
import jax.numpy as jnp
from jax.experimental import pallas as pl
from jax.experimental.pallas import tpu as pltpu


def _round_up(x, m):
    return ((x + m - 1) // m) * m


def _feedback_fused_kernel(low_ref, hix_ref, hiy_ref, hiz_ref, w_ref, b_ref,
                           out_ref):
    """Fused Feedback forward on one row tile.

    low_ref : (TR, MP)     lane-dense [low_x|low_y|low_z|0-pad]
    hix_ref : (TR, H)      hi_x rows
    hiy_ref : (TR, H)      hi_y rows
    hiz_ref : (TR, H)      hi_z rows
    w_ref   : (3H, 2*MP)   block-diagonal fused weights * 0.5 (bf16)
    b_ref   : (1, 2*MP)    fused biases * 0.5 (bf16)
    out_ref : (TR, MP)     low * (0.25*(tanh(s_a)+tanh(s_b)) + 0.5)
    """
    H = hix_ref.shape[-1]
    mp = out_ref.shape[-1]
    wdt = w_ref.dtype

    # Three small K=H contractions accumulate into one (TR, 2*MP) logit slab.
    # (MXU has huge slack here; this avoids an HBM concat of the hi tensors.)
    s = jnp.dot(hix_ref[...].astype(wdt), w_ref[0:H, :],
                preferred_element_type=jnp.float32)
    s = s + jnp.dot(hiy_ref[...].astype(wdt), w_ref[H:2 * H, :],
                    preferred_element_type=jnp.float32)
    s = s + jnp.dot(hiz_ref[...].astype(wdt), w_ref[2 * H:3 * H, :],
                    preferred_element_type=jnp.float32)
    s = s + b_ref[...].astype(jnp.float32)

    # Weights/biases are pre-scaled by 0.5, so s == logits/2 and
    # 0.5*(sigmoid(2*s_a) + sigmoid(2*s_b)) == 0.25*(tanh(s_a)+tanh(s_b)) + 0.5
    # exactly -> one EUP op per logit instead of exp + reciprocal.
    mask = 0.25 * (jnp.tanh(s[:, :mp]) + jnp.tanh(s[:, mp:])) + 0.5
    out_ref[...] = (low_ref[...] * mask).astype(out_ref.dtype)


def make_linear_params(key, in_dim, out_dim):
    """nn.Linear-style init (uniform +-1/sqrt(in_dim)); weight stored (in, out)."""
    kw, kb = jax.random.split(key)
    bound = 1.0 / jnp.sqrt(jnp.float32(in_dim))
    w = jax.random.uniform(kw, (in_dim, out_dim), jnp.float32, -bound, bound)
    b = jax.random.uniform(kb, (1, out_dim), jnp.float32, -bound, bound)
    return w, b


def make_feedback_params(key, hidden_dim, mod1_sz, mod2_sz, mod3_sz):
    keys = jax.random.split(key, 6)
    return {
        "f1": {"mask1": make_linear_params(keys[0], hidden_dim, mod1_sz),
               "mask2": make_linear_params(keys[1], hidden_dim, mod1_sz)},
        "f2": {"mask1": make_linear_params(keys[2], hidden_dim, mod2_sz),
               "mask2": make_linear_params(keys[3], hidden_dim, mod2_sz)},
        "f3": {"mask1": make_linear_params(keys[4], hidden_dim, mod3_sz),
               "mask2": make_linear_params(keys[5], hidden_dim, mod3_sz)},
    }


def fuse_feedback_params(params, hidden_dim, mod1_sz, mod2_sz, mod3_sz,
                         dtype=jnp.bfloat16):
    """Pack the six Linear layers into one block-diagonal weight / bias pair.

    Row blocks correspond to [hi_x | hi_y | hi_z]; output column blocks are
    [unit1 (M1) | unit2 (M2) | unit3 (M3) | zero pad to 128] for the mask1
    path, followed by the same layout for the mask2 path.
    Weights/biases are pre-scaled by 0.5 and stored in bf16 (half the weight
    bytes, single-pass bf16 MXU) to enable the tanh sigmoid identity in-kernel.
    """
    H = hidden_dim
    M1, M2, M3 = mod1_sz, mod2_sz, mod3_sz
    Mtot = M1 + M2 + M3
    MP = _round_up(max(Mtot, 128), 128)

    w1a, b1a = params["f1"]["mask1"]; w1b, b1b = params["f1"]["mask2"]
    w2a, b2a = params["f2"]["mask1"]; w2b, b2b = params["f2"]["mask2"]
    w3a, b3a = params["f3"]["mask1"]; w3b, b3b = params["f3"]["mask2"]

    # mask1 path: f1 consumes hi_y, f2 consumes hi_x, f3 consumes hi_x
    wa = jnp.zeros((3 * H, MP), jnp.float32)
    wa = wa.at[H:2 * H, 0:M1].set(w1a)
    wa = wa.at[0:H, M1:M1 + M2].set(w2a)
    wa = wa.at[0:H, M1 + M2:Mtot].set(w3a)

    # mask2 path: f1 consumes hi_z, f2 consumes hi_z, f3 consumes hi_y
    wb = jnp.zeros((3 * H, MP), jnp.float32)
    wb = wb.at[2 * H:3 * H, 0:M1].set(w1b)
    wb = wb.at[2 * H:3 * H, M1:M1 + M2].set(w2b)
    wb = wb.at[H:2 * H, M1 + M2:Mtot].set(w3b)

    ba = jnp.zeros((1, MP), jnp.float32).at[:, 0:Mtot].set(
        jnp.concatenate([b1a, b2a, b3a], axis=1))
    bb = jnp.zeros((1, MP), jnp.float32).at[:, 0:Mtot].set(
        jnp.concatenate([b1b, b2b, b3b], axis=1))

    w = 0.5 * jnp.concatenate([wa, wb], axis=1)   # (3H, 2*MP)
    b = 0.5 * jnp.concatenate([ba, bb], axis=1)   # (1, 2*MP)
    return {"w": w.astype(dtype), "b": b.astype(dtype)}


def feedback_forward(fused, low_x, low_y, low_z, hi_x, hi_y, hi_z,
                     lengths=None, row_tile=1024):
    """Fused Feedback.forward.  Activations are (..., feat); flattened to
    (B*T, feat).  low is packed into one 128-lane slab by a single fused
    concat producer; hi tensors are passed separately (reshape is free)."""
    del lengths  # static-mask variant ignores lengths
    M1 = low_x.shape[-1]
    M2 = low_y.shape[-1]
    M3 = low_z.shape[-1]
    H = hi_x.shape[-1]
    Mtot = M1 + M2 + M3
    K = fused["w"].shape[0]           # 3*H
    MP = fused["w"].shape[-1] // 2
    assert K == 3 * H

    lead = low_x.shape[:-1]
    N = 1
    for d in lead:
        N *= d

    # Single fused producer for the lane-dense low slab (no .at[].set double
    # pass, no row padding copy).
    low_slab = jnp.concatenate(
        [low_x.reshape(N, M1), low_y.reshape(N, M2), low_z.reshape(N, M3),
         jnp.zeros((N, MP - Mtot), low_x.dtype)],
        axis=-1)

    # hi stays un-concatenated; 3-D -> 2-D reshape costs nothing.
    hix = hi_x.reshape(N, H)
    hiy = hi_y.reshape(N, H)
    hiz = hi_z.reshape(N, H)

    # Row tile: ensure >= ~4 grid steps (v7x shards 'parallel' rows across
    # both TensorCores and each core still software-pipelines), sublane
    # aligned; cap at row_tile for large N so DMAs stay long.
    tr = min(_round_up(row_tile, 8), max(8, _round_up(pl.cdiv(N, 4), 8)))
    grid = (pl.cdiv(N, tr),)   # edge block (if any) handled by masked store

    out = pl.pallas_call(
        _feedback_fused_kernel,
        out_shape=jax.ShapeDtypeStruct((N, MP), low_slab.dtype),
        grid_spec=pltpu.PrefetchScalarGridSpec(
            num_scalar_prefetch=0,
            grid=grid,
            in_specs=[
                pl.BlockSpec((tr, MP), lambda i: (i, 0)),       # low slab
                pl.BlockSpec((tr, H), lambda i: (i, 0)),        # hi_x
                pl.BlockSpec((tr, H), lambda i: (i, 0)),        # hi_y
                pl.BlockSpec((tr, H), lambda i: (i, 0)),        # hi_z
                pl.BlockSpec((K, 2 * MP), lambda i: (0, 0)),    # fused weight
                pl.BlockSpec((1, 2 * MP), lambda i: (0, 0)),    # fused bias
            ],
            out_specs=pl.BlockSpec((tr, MP), lambda i: (i, 0)),
        ),
        compiler_params=pltpu.CompilerParams(
            dimension_semantics=("parallel",),
            vmem_limit_bytes=32 * 1024 * 1024),  # above v5e's 16 MiB default
        input_output_aliases={0: 0},   # low slab is consumed in place
    )(low_slab, hix, hiy, hiz, fused["w"], fused["b"])

    # TODO(synk): downstream consumers could take the fused (N, 128) slab
    # directly and skip these slice passes.
    x_new = out[:, 0:M1].reshape(lead + (M1,))
    y_new = out[:, M1:M1 + M2].reshape(lead + (M2,))
    z_new = out[:, M1 + M2:Mtot].reshape(lead + (M3,))
    return x_new, y_new, z_new


def feedback_forward_ref(params, low_x, low_y, low_z, hi_x, hi_y, hi_z):
    """Pure-JAX f32 reference for correctness checking."""
    def unit(low, ha, hb, wa, ba, wb, bb):
        ma = jax.nn.sigmoid(jnp.einsum("bth,hm->btm", ha, wa) + ba[0])
        mb = jax.nn.sigmoid(jnp.einsum("bth,hm->btm", hb, wb) + bb[0])
        return low * (0.5 * (ma + mb))

    x = unit(low_x, hi_y, hi_z, *params["f1"]["mask1"], *params["f1"]["mask2"])
    y = unit(low_y, hi_x, hi_z, *params["f2"]["mask1"], *params["f2"]["mask2"])
    z = unit(low_z, hi_x, hi_y, *params["f3"]["mask1"], *params["f3"]["mask2"])
    return x, y, z


if __name__ == "__main__":
    B, T = 2, 8
    hidden_dim = 32
    mod1_sz, mod2_sz, mod3_sz = 16, 24, 32

    key = jax.random.PRNGKey(0)
    kp, k1, k2, k3, k4, k5, k6 = jax.random.split(key, 7)

    params = make_feedback_params(kp, hidden_dim, mod1_sz, mod2_sz, mod3_sz)
    fused = fuse_feedback_params(params, hidden_dim, mod1_sz, mod2_sz, mod3_sz)

    low_x = jax.random.normal(k1, (B, T, mod1_sz), jnp.float32)
    low_y = jax.random.normal(k2, (B, T, mod2_sz), jnp.float32)
    low_z = jax.random.normal(k3, (B, T, mod3_sz), jnp.float32)
    hi_x = jax.random.normal(k4, (B, T, hidden_dim), jnp.float32)
    hi_y = jax.random.normal(k5, (B, T, hidden_dim), jnp.float32)
    hi_z = jax.random.normal(k6, (B, T, hidden_dim), jnp.float32)

    fwd = jax.jit(feedback_forward)
    out = fwd(fused, low_x, low_y, low_z, hi_x, hi_y, hi_z)
    out = jax.block_until_ready(out)

    ref = feedback_forward_ref(params, low_x, low_y, low_z, hi_x, hi_y, hi_z)
    for o, r in zip(out, ref):
        assert o.shape == r.shape and o.dtype == r.dtype
        # bf16 weights / in-kernel bf16 matmul -> relaxed tolerance vs f32 ref.
        assert jnp.allclose(o, r, atol=2e-2, rtol=2e-2), "mismatch vs reference"

    print("KERNEL_OK")
</pallas_src>

<mosaic_0001>
module attributes {stable_mosaic.version = 11 : i64} {
  func.func @_feedback_fused_kernel(%arg0: i32, %arg1: memref<8x128xf32, #tpu.memory_space<vmem>>, %arg2: memref<8x32xf32, #tpu.memory_space<vmem>>, %arg3: memref<8x32xf32, #tpu.memory_space<vmem>>, %arg4: memref<8x32xf32, #tpu.memory_space<vmem>>, %arg5: memref<96x256xbf16, #tpu.memory_space<vmem>>, %arg6: memref<1x256xbf16, #tpu.memory_space<vmem>>, %arg7: memref<8x128xf32, #tpu.memory_space<vmem>>) attributes {dimension_semantics = [#tpu.dimension_semantics<parallel>], iteration_bounds = array<i64: 2>, scalar_prefetch = 0 : i64, scratch_operands = 0 : i64, tpu.core_type = #tpu.core_type<tc>, window_params = [{transform_indices = @transform_0, window_bounds = array<i64: 8, 128>}, {transform_indices = @transform_1, window_bounds = array<i64: 8, 32>}, {transform_indices = @transform_2, window_bounds = array<i64: 8, 32>}, {transform_indices = @transform_3, window_bounds = array<i64: 8, 32>}, {pipeline_mode = #tpu.pipeline_mode<synchronous>, transform_indices = @transform_4, window_bounds = array<i64: 96, 256>}, {pipeline_mode = #tpu.pipeline_mode<synchronous>, transform_indices = @transform_5, window_bounds = array<i64: 1, 256>}, {transform_indices = @transform_6, window_bounds = array<i64: 8, 128>}]} {
    %c0 = arith.constant 0 : index
    %c0_0 = arith.constant 0 : index
    %0 = vector.load %arg2[%c0, %c0_0] : memref<8x32xf32, #tpu.memory_space<vmem>>, vector<8x32xf32>
    %1 = arith.truncf %0 : vector<8x32xf32> to vector<8x32xbf16>
    %c0_1 = arith.constant 0 : index
    %c0_2 = arith.constant 0 : index
    %2 = vector.load %arg5[%c0_1, %c0_2] : memref<96x256xbf16, #tpu.memory_space<vmem>>, vector<32x256xbf16>
    %cst = arith.constant dense<0.000000e+00> : vector<8x256xf32>
    %3 = tpu.matmul %1, %2, %cst {dimension_numbers = #tpu.dot_dimension_numbers<[1], [0], [0], [1], [0, 0, 1, 1], [], []>} : vector<8x32xbf16>, vector<32x256xbf16>, vector<8x256xf32> -> vector<8x256xf32>
    %c0_3 = arith.constant 0 : index
    %c0_4 = arith.constant 0 : index
    %4 = vector.load %arg3[%c0_3, %c0_4] : memref<8x32xf32, #tpu.memory_space<vmem>>, vector<8x32xf32>
    %5 = arith.truncf %4 : vector<8x32xf32> to vector<8x32xbf16>
    %c32 = arith.constant 32 : index
    %c0_5 = arith.constant 0 : index
    %6 = vector.load %arg5[%c32, %c0_5] : memref<96x256xbf16, #tpu.memory_space<vmem>>, vector<32x256xbf16>
    %cst_6 = arith.constant dense<0.000000e+00> : vector<8x256xf32>
    %7 = tpu.matmul %5, %6, %cst_6 {dimension_numbers = #tpu.dot_dimension_numbers<[1], [0], [0], [1], [0, 0, 1, 1], [], []>} : vector<8x32xbf16>, vector<32x256xbf16>, vector<8x256xf32> -> vector<8x256xf32>
    %8 = arith.addf %3, %7 : vector<8x256xf32>
    %c0_7 = arith.constant 0 : index
    %c0_8 = arith.constant 0 : index
    %9 = vector.load %arg4[%c0_7, %c0_8] : memref<8x32xf32, #tpu.memory_space<vmem>>, vector<8x32xf32>
    %10 = arith.truncf %9 : vector<8x32xf32> to vector<8x32xbf16>
    %c64 = arith.constant 64 : index
    %c0_9 = arith.constant 0 : index
    %11 = vector.load %arg5[%c64, %c0_9] : memref<96x256xbf16, #tpu.memory_space<vmem>>, vector<32x256xbf16>
    %cst_10 = arith.constant dense<0.000000e+00> : vector<8x256xf32>
    %12 = tpu.matmul %10, %11, %cst_10 {dimension_numbers = #tpu.dot_dimension_numbers<[1], [0], [0], [1], [0, 0, 1, 1], [], []>} : vector<8x32xbf16>, vector<32x256xbf16>, vector<8x256xf32> -> vector<8x256xf32>
    %13 = arith.addf %8, %12 : vector<8x256xf32>
    %c0_11 = arith.constant 0 : index
    %c0_12 = arith.constant 0 : index
    %14 = vector.load %arg6[%c0_11, %c0_12] : memref<1x256xbf16, #tpu.memory_space<vmem>>, vector<1x256xbf16>
    %15 = arith.extf %14 : vector<1x256xbf16> to vector<1x256xf32>
    %16 = vector.broadcast %15 : vector<1x256xf32> to vector<8x256xf32>
    %17 = arith.addf %13, %16 : vector<8x256xf32>
    %18 = vector.extract_strided_slice %17 {offsets = [0, 0], sizes = [8, 128], strides = [1, 1]} : vector<8x256xf32> to vector<8x128xf32>
    %19 = math.tanh %18 : vector<8x128xf32>
    %20 = vector.extract_strided_slice %17 {offsets = [0, 128], sizes = [8, 128], strides = [1, 1]} : vector<8x256xf32> to vector<8x128xf32>
    %21 = math.tanh %20 : vector<8x128xf32>
    %22 = arith.addf %19, %21 : vector<8x128xf32>
    %cst_13 = arith.constant 2.500000e-01 : f32
    %23 = vector.broadcast %cst_13 : f32 to vector<8x128xf32>
    %24 = arith.mulf %23, %22 : vector<8x128xf32>
    %cst_14 = arith.constant 5.000000e-01 : f32
    %25 = vector.broadcast %cst_14 : f32 to vector<8x128xf32>
    %26 = arith.addf %24, %25 : vector<8x128xf32>
    %c0_15 = arith.constant 0 : index
    %c0_16 = arith.constant 0 : index
    %27 = vector.load %arg1[%c0_15, %c0_16] : memref<8x128xf32, #tpu.memory_space<vmem>>, vector<8x128xf32>
    %28 = arith.mulf %27, %26 : vector<8x128xf32>
    %c0_17 = arith.constant 0 : index
    %c0_18 = arith.constant 0 : index
    %29 = vector.load %arg7[%c0_17, %c0_18] : memref<8x128xf32, #tpu.memory_space<vmem>>, vector<8x128xf32>
    tpu.vector_store %arg7[%c0_17, %c0_18], %28 {strides = array<i32>} : memref<8x128xf32, #tpu.memory_space<vmem>>, vector<8x128xf32>,
    return
  }
  func.func @transform_0(%arg0: i32) -> (i32, i32) {
    %c0_i32 = arith.constant 0 : i32
    %c0_i32_0 = arith.constant 0 : i32
    return %arg0, %c0_i32 : i32, i32
  }
  func.func @transform_1(%arg0: i32) -> (i32, i32) {
    %c0_i32 = arith.constant 0 : i32
    %c0_i32_0 = arith.constant 0 : i32
    return %arg0, %c0_i32 : i32, i32
  }
  func.func @transform_2(%arg0: i32) -> (i32, i32) {
    %c0_i32 = arith.constant 0 : i32
    %c0_i32_0 = arith.constant 0 : i32
    return %arg0, %c0_i32 : i32, i32
  }
  func.func @transform_3(%arg0: i32) -> (i32, i32) {
    %c0_i32 = arith.constant 0 : i32
    %c0_i32_0 = arith.constant 0 : i32
    return %arg0, %c0_i32 : i32, i32
  }
  func.func @transform_4(%arg0: i32) -> (i32, i32) {
    %c0_i32 = arith.constant 0 : i32
    %c0_i32_0 = arith.constant 0 : i32
    %c0_i32_1 = arith.constant 0 : i32
    return %c0_i32, %c0_i32_0 : i32, i32
  }
  func.func @transform_5(%arg0: i32) -> (i32, i32) {
    %c0_i32 = arith.constant 0 : i32
    %c0_i32_0 = arith.constant 0 : i32
    %c0_i32_1 = arith.constant 0 : i32
    return %c0_i32, %c0_i32_0 : i32, i32
  }
  func.func @transform_6(%arg0: i32) -> (i32, i32) {
    %c0_i32 = arith.constant 0 : i32
    %c0_i32_0 = arith.constant 0 : i32
    return %arg0, %c0_i32 : i32, i32
  }
}

</mosaic_0001>

<bundles_post_ra>
// kernel: feedback_forward.1
= control target key start
LH: loop header
LB: loop body
LE: loop exit
PB: predicated region body
PF: predicated region fallthrough
CT: control target
= control target key end

     0   :  { %11 = vsyncpa [#allocation3], 0  ;;  %s789_s21 = smov 0   ;;  %s834_s0 = inlined_call_operand.vmem [shape: f32[16,128], index: 0, kind: input, shape index: {}, may-alias: {0,6}]   ;;  %s835_s1 = inlined_call_operand.vmem [shape: f32[16,32], index: 1, kind: input, shape index: {}]   ;;  %s836_s2 = inlined_call_operand.vmem [shape: f32[16,32], index: 2, kind: input, shape index: {}]   ;;  %s837_s3 = inlined_call_operand.vmem [shape: f32[16,32], index: 3, kind: input, shape index: {}]   ;;  %s838_s4 = inlined_call_operand.hbm [shape: bf16[96,256], index: 4, kind: input, shape index: {}]   ;;  %s839_s5 = inlined_call_operand.vmem [shape: bf16[1,256], index: 5, kind: input, shape index: {}]   ;;  %s840_s6 = inlined_call_operand.vmem [shape: f32[16,128], index: 6, kind: output, shape index: {}, may-alias: {0,6}]  }
   0x1 LB: > { %s205_s24 = sshll.u32 %s838_s4, 4  ;;  %s604_s25 = sadd.s32 4294967295, %s749_s21   ;;  %s749_s21 = sphi %s789_s21, %s17_s21   ;;  %s206_s24 = int_to_ptr.hbm [resolvable:$true] %s205_s24 }
   0x2   : > { %p606_p0 = scmp.ge.s32.totalorder %s749_s21, 1  ;;  %p194_p1 = scmp.lt.s32.totalorder %s749_s21, 3 }
   0x3   : > { %p692_p2 = scmp.eq.s32.totalorder %s604_s25, 0  ;;  %s751_s26 = smov [#allocation2]  }
   0x4   : > { %p195_p3 = pnand %p606_p0, %p194_p1  ;;  %s207_s27 = sshll.u32 %s751_s26, 4  ;;  %s208_s27 = int_to_ptr.vmem [resolvable:$true] %s207_s27 }
   0x5   : > { %s752_s28 = smov 128   ;;  %s753_s29 = smov 8  }
   0x6   : > { %p688_p4 = pneg %p195_p3  ;;  %254 = sbr.rel (%p195_p3) target bundleno = 187 (0xbb), region = 44 }
   0x8   : > { %p689_p5 = pnand %p692_p2, %p688_p4 }
   0xa   : > { %691 = dma.hbm_to_vmem [thread:$0]  (!%p689_p5), %s206_s24, 1536, %s208_s27, [#allocation3], %s752_s28, %s752_s28, %s753_s29  }
   0xb   : > { %744 = dma.done.wait (%p692_p2), [#allocation3], 1536  }
   0xc   : > { %746 = vsyncadd (%p692_p2), [#allocation3], 4294965760  ;;  %p295_p6 = scmp.lt.s32.totalorder %s604_s25, 1  ;;  %v626_v0 = vld [vmem:[#allocation2 + $0x30] sm:$0xf]  ;;  %vm348_vm0 = vcmask 261120  }
   0xd   : > { %v679_v1 = vld [vmem:[#allocation2 + $0x34] sm:$0xf0]  ;;  %v678_v2 = vld [vmem:[#allocation2 + $0x34] sm:$0xf]  ;;  %v628_v4 = vld [vmem:[#allocation2 + $0x38] sm:$0xf0] }
   0xe   : > { %s842_s25 = smov (!%p295_p6, %s604_s25), 1  ;;  %v627_v3 = vor.u32 %v679_v1, %v626_v0  ;;  %v644_v5 = vld [vmem:[#allocation2 + $0x10] sm:$0xf]  ;;  %v675_v6 = vld [vmem:[#allocation2 + $0x14] sm:$0xf0]  ;;  %v631_v7 = vor.u32 %v678_v2, %v628_v4 }
   0xf   : > { %s800_s30 = sshll.u32 %s842_s25, 3  ;;  %v645_v8 = vor.u32 %v675_v6, %v644_v5  ;;  %v674_v9 = vld [vmem:[#allocation2 + $0x14] sm:$0xf]  ;;  %v646_v10 = vld [vmem:[#allocation2 + $0x18] sm:$0xf0] }
  0x10   : > { %v618_v11 = vld [vmem:[#allocation2 + $0x20] sm:$0xf]  ;;  %s306_s9 = scalar_lea.vmem %s836_s2, %s800_s30  ;;  %s302_s12 = scalar_lea.vmem %s835_s1, %s800_s30  ;;  %358 = vmatpush.bf16.msra.mxu0 %v627_v3  ;;  %v649_v12 = vor.u32 %v674_v9, %v646_v10  ;;  %v677_v13 = vld [vmem:[#allocation2 + $0x24] sm:$0xf0]  ;;  %v676_v14 = vld [vmem:[#allocation2 + $0x24] sm:$0xf]  ;;  %371 = vmatpush.bf16.msra.mxu1 %v631_v7 }
  0x11   : > { %v620_v15 = vld [vmem:[#allocation2 + $0x28] sm:$0xf0]  ;;  %407 = vmatpush.bf16.msra.mxu2 %v645_v8  ;;  %v619_v16 = vor.u32 %v677_v13, %v618_v11  ;;  %v636_v18 = vld [vmem:[#allocation2] sm:$0xf]  ;;  %v673_v19 = vld [vmem:[#allocation2 + $0x4] sm:$0xf0]  ;;  %s310_s15 = scalar_lea.vmem %s837_s3, %s800_s30  ;;  %s298_s20 = scalar_lea.vmem %s834_s0, %s800_s30 }
  0x12   : > { %v623_v17 = vor.u32 %v676_v14, %v620_v15  ;;  %v672_v20 = vld [vmem:[#allocation2 + $0x4] sm:$0xf]  ;;  %420 = vmatpush.bf16.msra.mxu3 %v649_v12  ;;  %v637_v21 = vor.u32 %v673_v19, %v636_v18  ;;  %v638_v22 = vld [vmem:[#allocation2 + $0x8] sm:$0xf0]  ;;  %v662_v27 = vld [vmem:[#allocation2 + $0x50] sm:$0xf]  ;;  %s314_s24 = scalar_lea.vmem %s840_s6, %s800_s30 }
  0x13   : > { %v322_v23 = vld [vmem:[%s306_s9] sm:$0xff]  ;;  %v641_v25 = vor.u32 %v672_v20, %v638_v22  ;;  %v683_v28 = vld [vmem:[#allocation2 + $0x54] sm:$0xf0]  ;;  %v682_v29 = vld [vmem:[#allocation2 + $0x54] sm:$0xf] }
  0x14   : > { %v316_v24 = vld [vmem:[%s302_s12] sm:$0xff]  ;;  %v323_v26 = vpack.c.bf16 %v322_v23, %v322_v23  ;;  %359 = vmatpush.bf16.msra.mxu0 %v619_v16  ;;  %v663_v31 = vor.u32 %v683_v28, %v662_v27  ;;  %v664_v32 = vld [vmem:[#allocation2 + $0x58] sm:$0xf0]  ;;  %v681_v34 = vld [vmem:[#allocation2 + $0x44] sm:$0xf0]  ;;  %372 = vmatpush.bf16.msra.mxu1 %v623_v17 }
  0x15   : > { %v317_v30 = vpack.c.bf16 %v316_v24, %v316_v24  ;;  %v654_v33 = vld [vmem:[#allocation2 + $0x40] sm:$0xf]  ;;  %408 = vmatpush.bf16.msra.mxu2 %v637_v21  ;;  %v667_v35 = vor.u32 %v682_v29, %v664_v32  ;;  %v680_v36 = vld [vmem:[#allocation2 + $0x44] sm:$0xf]  ;;  %v656_v37 = vld [vmem:[#allocation2 + $0x48] sm:$0xf0] }
  0x16   : > { %421 = vmatpush.bf16.msra.mxu3 %v641_v25  ;;  %v655_v38 = vor.u32 %v681_v34, %v654_v33  ;;  %v659_v39 = vor.u32 %v680_v36, %v656_v37  ;;  %v427_v40 = vld [vmem:[%s310_s15] sm:$0xff] }
  0x17   : > { %632 = vmatmul.msk.bf16.vlgmr.msra.gmra.mxu0 %vm348_vm0, %v323_v26  ;;  %633 = vmatmul.msk.bf16.vlgmr.msra.gmra.mxu1 %vm348_vm0, %v323_v26  ;;  %v428_v41 = vpack.c.bf16 %v427_v40, %v427_v40  ;;  %v484_v44 = vld [vmem:[%s839_s5] sm:$0x3] }
  0x18   : > { %462 = vmatpush.bf16.msrb.mxu0 %v663_v31  ;;  %475 = vmatpush.bf16.msrb.mxu1 %v667_v35  ;;  %v485_v46 = vunpack.c.l.bf16 %v484_v44  ;;  %v500_v6 = vld [vmem:[%s298_s20] sm:$0xff] }
  0x19   : > { %650 = vmatmul.msk.bf16.vlgmr.msra.gmra.mxu2 %vm348_vm0, %v317_v30  ;;  %651 = vmatmul.msk.bf16.vlgmr.msra.gmra.mxu3 %vm348_vm0, %v317_v30 }
  0x1a   : > { %v487_v50 = vperm.slane %v485_v46, 0  ;;  %v488_v51 = vperm.slane %v485_v46, 2 }
  0x1c   : > { %463 = vmatpush.bf16.msrb.mxu0 %v655_v38  ;;  %476 = vmatpush.bf16.msrb.mxu1 %v659_v39  ;;  %v491_v54 = vperm.slane %v487_v50, 0  ;;  %v492_v58 = vperm.slane %v488_v51, 0 }
  0x27   : > { %668 = vmatmul.msk.bf16.vlgmr.msrb.gmra.mxu0 %vm348_vm0, %v428_v41  ;;  %669 = vmatmul.msk.bf16.vlgmr.msrb.gmra.mxu1 %vm348_vm0, %v428_v41 }
  0x94   : > { %v361_v42 = vpop.f32.mrf.mxu0  ;;  %v374_v43 = vpop.f32.mrf.mxu1 }
  0x9c   : > { %v410_v45 = vpop.f32.mrf.mxu2  ;;  %v423_v47 = vpop.f32.mrf.mxu3 }
  0x9d   : > { %v363_v48 = vpop.f32.mrf.mxu0  ;;  %v376_v49 = vpop.f32.mrf.mxu1  ;;  %v411_v52 = vadd.f32 %v410_v45, %v361_v42  ;;  %v424_v55 = vadd.f32 %v423_v47, %v374_v43 }
  0xa4   : > { %v412_v53 = vpop.f32.mrf.mxu2  ;;  %v425_v56 = vpop.f32.mrf.mxu3 }
  0xa5   : > { %v465_v57 = vpop.f32.mrf.mxu0  ;;  %v478_v60 = vpop.f32.mrf.mxu1 }
  0xa6   : > { %v482_v59 = vadd.f32 %v465_v57, %v411_v52  ;;  %v483_v61 = vadd.f32 %v478_v60, %v424_v55 }
  0xa8   : > { %v493_v62 = vadd.f32 %v491_v54, %v482_v59  ;;  %v494_v63 = vadd.f32 %v492_v58, %v483_v61 }
  0xaa   : > { %705 = vtanh.f32 %v493_v62 }
  0xab   : > { %707 = vtanh.f32 %v494_v63 }
  0xad   : > { %v467_v0 = vpop.f32.mrf.mxu0  ;;  %v480_v1 = vpop.f32.mrf.mxu1 }
  0xb0   : > { %v706_v2 = vpop.eup %705 }
  0xb1   : > { %v708_v3 = vpop.eup %707 }
  0xb2   : > { %v497_v4 = vadd.f32 %v708_v3, %v706_v2 }
  0xb4   : > { %v498_v5 = vmul.f32 0.25, %v497_v4 }
  0xb6   : > { %v499_v7 = vadd.f32 0.5, %v498_v5 }
  0xb8   : > { %v501_v8 = vmul.f32 %v500_v6, %v499_v7 }
  0xba   : > { %502 = vst [vmem:[%s314_s24] sm:$0xff] %v501_v8 }
  0xbb PF: > { %s17_s21 = sadd.s32 1, %s749_s21  }
  0xbc   : > { %p14_p7 = scmp.ge.s32.totalorder %s17_s21, 4  }
  0xbe   :  { %16 = sbr.rel (!%p14_p7) target bundleno = 1 (0x1), region = 88 }
  0xc3   :  { %522 = vsyncpa [#allocation3], 1 }
  0xc4   :  { %524 = vsyncpa [#allocation3 + $0x1], 1 }

</bundles_post_ra>
